<compile_context>
chip_gen: v6e
topology: v6e:2x2x1
jax: 0.10.0
libtpu: 0.0.40
codegen_flags: <defaults>
</compile_context>

<pallas_src>
import jax
import jax.numpy as jnp
import numpy as np
from jax.experimental import pallas as pl
from jax.experimental.pallas import tpu as pltpu

INPUT_DIM = 32   # LTNNetwork embedding_dim -> SameClassPredicate input_dim
HIDDEN = 32      # nn.Linear(input_dim * 2, 32)


def _round_up(n: int, m: int) -> int:
    return ((n + m - 1) // m) * m


def _same_class_kernel(x_ref, y_ref, w1x_ref, w1y_ref, b1_ref, w2r_ref, b2_ref, o_ref):
    # h = ReLU(concat([x, y], -1) @ W1 + b1) == ReLU(x @ W1_top + y @ W1_bot + b1).
    # bf16 MXU inputs, f32 accumulation; bias/ReLU in f32.
    h = (
        jnp.dot(x_ref[...], w1x_ref[...], preferred_element_type=jnp.float32)
        + jnp.dot(y_ref[...], w1y_ref[...], preferred_element_type=jnp.float32)
        + b1_ref[...]
    )
    h = jnp.maximum(h, 0.0)                                      # (TB, H) f32

    # z[t] = sum_k h[t, k] * w2[k].  Computed as (8, H) x (TB, H) contracting H
    # (w2^T replicated over 8 sublanes so the MXU M-dim stays tile-aligned); the
    # result lands lane-dense as (8, TB) and row 0 is the (1, TB) output slab —
    # no (TB, 1) masked stores and no in-kernel transpose/relayout.
    z = jax.lax.dot_general(
        w2r_ref[...], h,
        dimension_numbers=(((1,), (1,)), ((), ())),
        preferred_element_type=jnp.float32,
    )                                                            # (8, TB)
    o_ref[...] = jax.nn.sigmoid(z[0:1, :] + b2_ref[...])         # (1, TB)


def same_class_predicate(x, y, w1, b1, w2, b2, *, block_rows=1024,
                         compute_dtype=jnp.bfloat16):
    """SameClassPredicate forward.

    x, y: [B, D] float32.  w1: [2D, H], b1: [H], w2: [H, 1], b2: [1].
    Returns [B, 1] float32 in (0, 1).
    """
    B, D = x.shape
    H = w1.shape[1]
    assert y.shape == (B, D) and w1.shape == (2 * D, H)

    # Fold the concat: never materialize concat([x, y]) (would be an extra HBM pass).
    w1x = w1[:D, :].astype(compute_dtype)                          # [D, H]
    w1y = w1[D:, :].astype(compute_dtype)                          # [D, H]
    b1_2d = b1.reshape(1, H).astype(jnp.float32)                   # [1, H]
    # w2^T replicated to 8 rows so the kernel's second dot has a tile-aligned M dim.
    w2r8 = jnp.tile(w2.reshape(1, H), (8, 1)).astype(jnp.float32)  # [8, H]
    b2_2d = b2.reshape(1, 1).astype(jnp.float32)                   # [1, 1]

    xb = x.astype(compute_dtype)
    yb = y.astype(compute_dtype)

    # Row-tile size: large (512-2048) for pipelined DMA near the HBM roofline, but
    # clamped for small batches (a block equal to the full array is always legal).
    # Multi-tile runs keep TB a multiple of 128 so the (1, TB) output stays lane-dense.
    tb = min(block_rows, _round_up(B, 8))
    tb = max(8, (tb // 8) * 8)
    if tb < B:
        tb = max(128, (tb // 128) * 128)
    num_tiles = pl.cdiv(B, tb)
    b_pad = num_tiles * tb
    if b_pad != B:
        # Zero-pad the ragged tail so the last tile never reads/writes garbage rows.
        xb = jnp.pad(xb, ((0, b_pad - B), (0, 0)))
        yb = jnp.pad(yb, ((0, b_pad - B), (0, 0)))

    # Per-tile VMEM: 2 inputs x 2 pipeline buffers x (tb, D) bf16 + (1, tb) f32 out
    # + ~9 KiB of resident weights -> well under the 32 MiB scoped default on
    # v5e/v6e/v7x even at tb=2048, so no vmem_limit_bytes override is needed.
    out = pl.pallas_call(
        _same_class_kernel,
        out_shape=jax.ShapeDtypeStruct((1, b_pad), jnp.float32),
        grid=(num_tiles,),
        in_specs=[
            pl.BlockSpec((tb, D), lambda i: (i, 0)),   # x tile
            pl.BlockSpec((tb, D), lambda i: (i, 0)),   # y tile
            pl.BlockSpec((D, H), lambda i: (0, 0)),    # W1 top half   (VMEM-resident)
            pl.BlockSpec((D, H), lambda i: (0, 0)),    # W1 bottom half (VMEM-resident)
            pl.BlockSpec((1, H), lambda i: (0, 0)),    # b1
            pl.BlockSpec((8, H), lambda i: (0, 0)),    # w2^T replicated
            pl.BlockSpec((1, 1), lambda i: (0, 0)),    # b2
        ],
        out_specs=pl.BlockSpec((1, tb), lambda i: (0, i)),
        compiler_params=pltpu.CompilerParams(
            dimension_semantics=("parallel",),   # 2 TCs on v7x; no-op on v5e/v6e
        ),
    )(xb, yb, w1x, w1y, b1_2d, w2r8, b2_2d)

    return out[0, :B].reshape(B, 1)


def _init_params(key, input_dim=INPUT_DIM, hidden=HIDDEN):
    """Deterministic init mirroring nn.Linear default (uniform +-1/sqrt(fan_in))."""
    k1, k2, k3, k4 = jax.random.split(key, 4)
    fan1 = 2 * input_dim
    bound1 = 1.0 / np.sqrt(fan1)
    w1 = jax.random.uniform(k1, (fan1, hidden), jnp.float32, -bound1, bound1)
    b1 = jax.random.uniform(k2, (hidden,), jnp.float32, -bound1, bound1)
    bound2 = 1.0 / np.sqrt(hidden)
    w2 = jax.random.uniform(k3, (hidden, 1), jnp.float32, -bound2, bound2)
    b2 = jax.random.uniform(k4, (1,), jnp.float32, -bound2, bound2)
    return w1, b1, w2, b2


def _reference_f32(x, y, w1, b1, w2, b2):
    cat = jnp.concatenate([x, y], axis=-1)
    h = jnp.maximum(cat @ w1 + b1, 0.0)
    return jax.nn.sigmoid(h @ w2 + b2)


def _reference_matched(x, y, w1, b1, w2, b2, compute_dtype=jnp.bfloat16):
    # Mirrors the kernel's precision choices (bf16 inputs / first-layer weights,
    # f32 accumulation and elementwise math) so the comparison can be tight.
    f32 = jnp.float32
    hp = jax.lax.Precision.HIGHEST
    xc = x.astype(compute_dtype).astype(f32)
    yc = y.astype(compute_dtype).astype(f32)
    w1c = w1.astype(compute_dtype).astype(f32)
    cat = jnp.concatenate([xc, yc], axis=-1)
    h = jnp.maximum(jnp.dot(cat, w1c, precision=hp) + b1, 0.0)
    return jax.nn.sigmoid(jnp.dot(h, w2, precision=hp) + b2)


if __name__ == "__main__":
    key = jax.random.PRNGKey(0)
    kx, ky, kp, kx2, ky2 = jax.random.split(key, 5)

    D = INPUT_DIM
    w1, b1, w2, b2 = _init_params(kp)

    # Small, module-consistent shapes: pairs of embedding_dim=32 object embeddings.
    B = 8
    x = jax.random.normal(kx, (B, D), jnp.float32)
    y = jax.random.normal(ky, (B, D), jnp.float32)
    out = jax.block_until_ready(same_class_predicate(x, y, w1, b1, w2, b2))
    assert out.shape == (B, 1)
    np.testing.assert_allclose(
        np.asarray(out), np.asarray(_reference_matched(x, y, w1, b1, w2, b2)),
        rtol=2e-3, atol=2e-3)
    np.testing.assert_allclose(  # sanity check vs. the pure-f32 module semantics
        np.asarray(out), np.asarray(_reference_f32(x, y, w1, b1, w2, b2)),
        rtol=5e-2, atol=5e-2)

    # Larger ragged batch: exercises the multi-tile parallel grid, VMEM-resident
    # weights, lane-dense (1, 512) output blocks, and the zero-padded last tile.
    B2 = 1000
    x2 = jax.random.normal(kx2, (B2, D), jnp.float32)
    y2 = jax.random.normal(ky2, (B2, D), jnp.float32)
    out2 = jax.block_until_ready(
        same_class_predicate(x2, y2, w1, b1, w2, b2, block_rows=512))
    assert out2.shape == (B2, 1)
    np.testing.assert_allclose(
        np.asarray(out2), np.asarray(_reference_matched(x2, y2, w1, b1, w2, b2)),
        rtol=2e-3, atol=2e-3)

    print("KERNEL_OK")
</pallas_src>

<mosaic_0001>
module attributes {stable_mosaic.version = 11 : i64} {
  func.func @_same_class_kernel(%arg0: i32, %arg1: memref<8x32xbf16, #tpu.memory_space<vmem>>, %arg2: memref<8x32xbf16, #tpu.memory_space<vmem>>, %arg3: memref<32x32xbf16, #tpu.memory_space<vmem>>, %arg4: memref<32x32xbf16, #tpu.memory_space<vmem>>, %arg5: memref<1x32xf32, #tpu.memory_space<vmem>>, %arg6: memref<8x32xf32, #tpu.memory_space<vmem>>, %arg7: memref<1x1xf32, #tpu.memory_space<vmem>>, %arg8: memref<1x8xf32, #tpu.memory_space<vmem>>) attributes {dimension_semantics = [#tpu.dimension_semantics<parallel>], iteration_bounds = array<i64: 1>, scalar_prefetch = 0 : i64, scratch_operands = 0 : i64, tpu.core_type = #tpu.core_type<tc>, window_params = [{transform_indices = @transform_0, window_bounds = array<i64: 8, 32>}, {transform_indices = @transform_1, window_bounds = array<i64: 8, 32>}, {pipeline_mode = #tpu.pipeline_mode<synchronous>, transform_indices = @transform_2, window_bounds = array<i64: 32, 32>}, {pipeline_mode = #tpu.pipeline_mode<synchronous>, transform_indices = @transform_3, window_bounds = array<i64: 32, 32>}, {pipeline_mode = #tpu.pipeline_mode<synchronous>, transform_indices = @transform_4, window_bounds = array<i64: 1, 32>}, {pipeline_mode = #tpu.pipeline_mode<synchronous>, transform_indices = @transform_5, window_bounds = array<i64: 8, 32>}, {pipeline_mode = #tpu.pipeline_mode<synchronous>, transform_indices = @transform_6, window_bounds = array<i64: 1, 1>}, {transform_indices = @transform_7, window_bounds = array<i64: 1, 8>}]} {
    %c0 = arith.constant 0 : index
    %c0_0 = arith.constant 0 : index
    %0 = vector.load %arg1[%c0, %c0_0] : memref<8x32xbf16, #tpu.memory_space<vmem>>, vector<8x32xbf16>
    %c0_1 = arith.constant 0 : index
    %c0_2 = arith.constant 0 : index
    %1 = vector.load %arg3[%c0_1, %c0_2] : memref<32x32xbf16, #tpu.memory_space<vmem>>, vector<32x32xbf16>
    %cst = arith.constant dense<0.000000e+00> : vector<8x32xf32>
    %2 = tpu.matmul %0, %1, %cst {dimension_numbers = #tpu.dot_dimension_numbers<[1], [0], [0], [1], [0, 0, 1, 1], [], []>} : vector<8x32xbf16>, vector<32x32xbf16>, vector<8x32xf32> -> vector<8x32xf32>
    %c0_3 = arith.constant 0 : index
    %c0_4 = arith.constant 0 : index
    %3 = vector.load %arg2[%c0_3, %c0_4] : memref<8x32xbf16, #tpu.memory_space<vmem>>, vector<8x32xbf16>
    %c0_5 = arith.constant 0 : index
    %c0_6 = arith.constant 0 : index
    %4 = vector.load %arg4[%c0_5, %c0_6] : memref<32x32xbf16, #tpu.memory_space<vmem>>, vector<32x32xbf16>
    %cst_7 = arith.constant dense<0.000000e+00> : vector<8x32xf32>
    %5 = tpu.matmul %3, %4, %cst_7 {dimension_numbers = #tpu.dot_dimension_numbers<[1], [0], [0], [1], [0, 0, 1, 1], [], []>} : vector<8x32xbf16>, vector<32x32xbf16>, vector<8x32xf32> -> vector<8x32xf32>
    %6 = arith.addf %2, %5 : vector<8x32xf32>
    %c0_8 = arith.constant 0 : index
    %c0_9 = arith.constant 0 : index
    %7 = vector.load %arg5[%c0_8, %c0_9] : memref<1x32xf32, #tpu.memory_space<vmem>>, vector<1x32xf32>
    %8 = vector.broadcast %7 : vector<1x32xf32> to vector<8x32xf32>
    %9 = arith.addf %6, %8 : vector<8x32xf32>
    %cst_10 = arith.constant 0.000000e+00 : f32
    %10 = vector.broadcast %cst_10 : f32 to vector<8x32xf32>
    %11 = arith.maximumf %9, %10 : vector<8x32xf32>
    %c0_11 = arith.constant 0 : index
    %c0_12 = arith.constant 0 : index
    %12 = vector.load %arg6[%c0_11, %c0_12] : memref<8x32xf32, #tpu.memory_space<vmem>>, vector<8x32xf32>
    %cst_13 = arith.constant dense<0.000000e+00> : vector<8x8xf32>
    %13 = tpu.matmul %12, %11, %cst_13 {dimension_numbers = #tpu.dot_dimension_numbers<[1], [1], [0], [0], [0, 0, 1, 0], [], []>} : vector<8x32xf32>, vector<8x32xf32>, vector<8x8xf32> -> vector<8x8xf32>
    %14 = vector.extract_strided_slice %13 {offsets = [0, 0], sizes = [1, 8], strides = [1, 1]} : vector<8x8xf32> to vector<1x8xf32>
    %c0_14 = arith.constant 0 : index
    %c0_15 = arith.constant 0 : index
    %15 = vector.load %arg7[%c0_14, %c0_15] : memref<1x1xf32, #tpu.memory_space<vmem>>, vector<1x1xf32>
    %16 = vector.broadcast %15 : vector<1x1xf32> to vector<1x8xf32>
    %17 = arith.addf %14, %16 : vector<1x8xf32>
    %18 = arith.negf %17 : vector<1x8xf32>
    %19 = math.exp %18 : vector<1x8xf32>
    %cst_16 = arith.constant 1.000000e+00 : f32
    %20 = vector.broadcast %cst_16 : f32 to vector<1x8xf32>
    %21 = arith.addf %20, %19 : vector<1x8xf32>
    %22 = arith.divf %20, %21 : vector<1x8xf32>
    %c0_17 = arith.constant 0 : index
    %c0_18 = arith.constant 0 : index
    %23 = vector.load %arg8[%c0_17, %c0_18] : memref<1x8xf32, #tpu.memory_space<vmem>>, vector<1x8xf32>
    tpu.vector_store %arg8[%c0_17, %c0_18], %22 {strides = array<i32>} : memref<1x8xf32, #tpu.memory_space<vmem>>, vector<1x8xf32>,
    return
  }
  func.func @transform_0(%arg0: i32) -> (i32, i32) {
    %c0_i32 = arith.constant 0 : i32
    %c0_i32_0 = arith.constant 0 : i32
    return %arg0, %c0_i32 : i32, i32
  }
  func.func @transform_1(%arg0: i32) -> (i32, i32) {
    %c0_i32 = arith.constant 0 : i32
    %c0_i32_0 = arith.constant 0 : i32
    return %arg0, %c0_i32 : i32, i32
  }
  func.func @transform_2(%arg0: i32) -> (i32, i32) {
    %c0_i32 = arith.constant 0 : i32
    %c0_i32_0 = arith.constant 0 : i32
    %c0_i32_1 = arith.constant 0 : i32
    return %c0_i32, %c0_i32_0 : i32, i32
  }
  func.func @transform_3(%arg0: i32) -> (i32, i32) {
    %c0_i32 = arith.constant 0 : i32
    %c0_i32_0 = arith.constant 0 : i32
    %c0_i32_1 = arith.constant 0 : i32
    return %c0_i32, %c0_i32_0 : i32, i32
  }
  func.func @transform_4(%arg0: i32) -> (i32, i32) {
    %c0_i32 = arith.constant 0 : i32
    %c0_i32_0 = arith.constant 0 : i32
    %c0_i32_1 = arith.constant 0 : i32
    return %c0_i32, %c0_i32_0 : i32, i32
  }
  func.func @transform_5(%arg0: i32) -> (i32, i32) {
    %c0_i32 = arith.constant 0 : i32
    %c0_i32_0 = arith.constant 0 : i32
    %c0_i32_1 = arith.constant 0 : i32
    return %c0_i32, %c0_i32_0 : i32, i32
  }
  func.func @transform_6(%arg0: i32) -> (i32, i32) {
    %c0_i32 = arith.constant 0 : i32
    %c0_i32_0 = arith.constant 0 : i32
    %c0_i32_1 = arith.constant 0 : i32
    return %c0_i32, %c0_i32_0 : i32, i32
  }
  func.func @transform_7(%arg0: i32) -> (i32, i32) {
    %c0_i32 = arith.constant 0 : i32
    %c0_i32_0 = arith.constant 0 : i32
    return %c0_i32, %arg0 : i32, i32
  }
}

</mosaic_0001>

<bundles_post_ra>
// kernel: tpu_custom_call.1
= control target key start
LH: loop header
LB: loop body
LE: loop exit
PB: predicated region body
PF: predicated region fallthrough
CT: control target
= control target key end

     0   :  { %s571_s0 = inlined_call_operand.hbm [shape: bf16[8,32], index: 0, kind: input, shape index: {}]   ;;  %s572_s1 = inlined_call_operand.hbm [shape: bf16[8,32], index: 1, kind: input, shape index: {}]   ;;  %s573_s2 = inlined_call_operand.hbm [shape: bf16[32,32], index: 2, kind: input, shape index: {}]   ;;  %s574_s3 = inlined_call_operand.hbm [shape: bf16[32,32], index: 3, kind: input, shape index: {}]   ;;  %s575_s4 = inlined_call_operand.vmem [shape: f32[1,32], index: 4, kind: input, shape index: {}]   ;;  %s576_s5 = inlined_call_operand.vmem [shape: f32[8,32], index: 5, kind: input, shape index: {}]   ;;  %s577_s6 = inlined_call_operand.<no memory space> [shape: f32[1,1], index: 6, kind: input, shape index: {}]   ;;  %s578_s7 = inlined_call_operand.hbm [shape: f32[1,8], index: 7, kind: output, shape index: {}]  }
   0x1   :  { %v12_v0 = vstv %s577_s6 }
   0x2   :  { %13 = vst [vmem:[#allocation2] sm:$0x1] %v12_v0 }
   0x3   :  { %14 = vsyncpa [#allocation4], 0 }
   0x4   :  { %15 = vsyncpa [#allocation7], 0 }
   0x5   :  { %16 = vsyncpa [#allocation10], 0 }
   0x6   :  { %17 = vsyncpa [#allocation5], 0  ;;  %s490_s26 = smov [#allocation6]   ;;  %s491_s28 = smov [#allocation3]  }
   0x7   :  { %s34_s27 = sshll.u32 %s490_s26, 4  ;;  %s24_s29 = sshll.u32 %s491_s28, 4  ;;  %s35_s27 = int_to_ptr.vmem [resolvable:$true] %s34_s27  ;;  %s25_s29 = int_to_ptr.vmem [resolvable:$true] %s24_s29 }
   0x8   :  { %s390_s30 = scalar_lea.vmem %s35_s27, 64  ;;  %p395_p1 = scmp.lt.s32.totalorder %s35_s27, %s35_s27 }
   0x9   :  { %p391_p0 = scmp.ne.s32.totalorder %s35_s27, %s390_s30  ;;  %p396_p2 = scmp.lt.s32.totalorder %s390_s30, %s390_s30 }
   0xb   :  { %p397_p3 = por %p396_p2, %p395_p1 }
   0xd   :  { %p398_p4 = pnand %p397_p3, %p391_p0 }
   0xf   :  { %401 = shalt.err (!%p398_p4)
}
  0x10   :  { %37 = dma.hbm_to_vmem [thread:$0]  %s572_s1, 64, %s35_s27, [#allocation7]  }
  0x11   :  { %s410_s9 = scalar_lea.vmem %s25_s29, 64  ;;  %p415_p6 = scmp.lt.s32.totalorder %s25_s29, %s25_s29 }
  0x12   :  { %p411_p5 = scmp.ne.s32.totalorder %s25_s29, %s410_s9  ;;  %p416_p7 = scmp.lt.s32.totalorder %s410_s9, %s410_s9 }
  0x14   :  { %p417_p8 = por %p416_p7, %p415_p6 }
  0x16   :  { %p418_p9 = pnand %p417_p8, %p411_p5 }
  0x18   :  { %421 = shalt.err (!%p418_p9)
}
  0x19   :  { %27 = dma.hbm_to_vmem [thread:$0]  %s571_s0, 64, %s25_s29, [#allocation4]  }
  0x1a   :  { %s492_s12 = smov [#allocation8]  }
  0x1b   :  { %s43_s13 = sshll.u32 %s492_s12, 4  ;;  %s44_s13 = int_to_ptr.vmem [resolvable:$true] %s43_s13 }
  0x1c   :  { %s430_s14 = scalar_lea.vmem %s44_s13, 256  ;;  %p435_p11 = scmp.lt.s32.totalorder %s44_s13, %s44_s13 }
  0x1d   :  { %p431_p10 = scmp.ne.s32.totalorder %s44_s13, %s430_s14  ;;  %p436_p12 = scmp.lt.s32.totalorder %s430_s14, %s430_s14 }
  0x1f   :  { %p437_p13 = por %p436_p12, %p435_p11 }
  0x21   :  { %p438_p0 = pnand %p437_p13, %p431_p10 }
  0x23   :  { %441 = shalt.err (!%p438_p0)
}
  0x24   :  { %s493_s1 = smov 64   ;;  %s494_s15 = smov 4  }
  0x25   :  { %49 = dma.hbm_to_vmem [thread:$0]  %s573_s2, 256, %s44_s13, [#allocation7], %s493_s1, %s493_s1, %s494_s15  }
  0x26   :  { %s495_s18 = smov [#allocation9]  }
  0x27   :  { %s55_s19 = sshll.u32 %s495_s18, 4  ;;  %s56_s19 = int_to_ptr.vmem [resolvable:$true] %s55_s19 }
  0x28   :  { %s450_s0 = scalar_lea.vmem %s56_s19, 256  ;;  %p455_p2 = scmp.lt.s32.totalorder %s56_s19, %s56_s19 }
  0x29   :  { %p451_p1 = scmp.ne.s32.totalorder %s56_s19, %s450_s0  ;;  %p456_p3 = scmp.lt.s32.totalorder %s450_s0, %s450_s0 }
  0x2b   :  { %p457_p4 = por %p456_p3, %p455_p2 }
  0x2d   :  { %p458_p5 = pnand %p457_p4, %p451_p1 }
  0x2f   :  { %461 = shalt.err (!%p458_p5)
}
  0x30   :  { %61 = dma.hbm_to_vmem [thread:$0]  %s574_s3, 256, %s56_s19, [#allocation10], %s493_s1, %s493_s1, %s494_s15  }
  0x31   :  { %482 = dma.done.wait [#allocation4], 64  }
  0x32   :  { %483 = vsyncadd [#allocation4], 4294967232 }
  0x33   :  { %484 = dma.done.wait [#allocation7], 320  }
  0x34   :  { %485 = vsyncadd [#allocation7], 4294966976 }
  0x35   :  { %486 = dma.done.wait [#allocation10], 256  }
  0x36   :  { %487 = vsyncadd [#allocation10], 4294967040  ;;  %v496_v1 = vmov 0.0   ;;  %vm497_vm0 = vmmov 0   ;;  %v374_v2 = vld [vmem:[#allocation9 + $0x8] sm:$0xff]   ;;  %v375_v3 = vld [vmem:[#allocation8 + $0x8] sm:$0xff]   ;;  %v294_v23 = vlaneseq }
  0x37   :  { %342 = vmatprep.subr.bf16.mxu0 %v496_v1  ;;  %350 = vmatprep.subr.bf16.mxu1 %v496_v1  ;;  %v376_v4 = vld [vmem:[#allocation9] sm:$0xff]   ;;  %v377_v5 = vld [vmem:[#allocation8] sm:$0xff]   ;;  %v86_v6 = vld [vmem:[#allocation6] sm:$0xf]  ;;  %vm103_vm1 = vcmask 261120   ;;  %v498_v9 = vmov 0  }
  0x38   :  { %346 = vmatprep.mubr.msk.bf16.mxu0 %vm497_vm0, %v496_v1  ;;  %354 = vmatprep.mubr.msk.bf16.mxu1 %vm497_vm0, %v496_v1  ;;  %v81_v7 = vld [vmem:[#allocation3] sm:$0xf]  ;;  %v288_v8 = vld [vmem:[#allocation2] sm:$0x1]  ;;  %v295_v24 = vshrl.u32 %v294_v23, 7  ;;  %vm305_vm2 = vcmask 57344  }
  0x39   :  { %343 = vmatpush3.bf16.msra.mxu0 %v374_v2  ;;  %351 = vmatpush3.bf16.msra.mxu1 %v375_v3  ;;  %v330_v12 = vld [vmem:[%s575_s4] ss:$0 sm:$0xff]  ;;  %s499_s4 = smov [#allocation11]  }
  0x3a   :  { %344 = vmatprep.subr.bf16.mxu0 %v496_v1  ;;  %352 = vmatprep.subr.bf16.mxu1 %v496_v1  ;;  %v211_v22 = vld [vmem:[%s576_s5] sm:$0xff]  ;;  %v296_v25 = vsub.s32 0, %v295_v24  ;;  %s313_s24 = sshll.u32 %s499_s4, 4  ;;  %s314_s24 = int_to_ptr.vmem [resolvable:$true] %s313_s24 }
  0x3b   :  { %373 = vset.pattern.permute.xlu0 %v498_v9  ;;  %s462_s5 = scalar_lea.vmem %s314_s24, 16  ;;  %s466_s25 = scalar_lea.vmem %s314_s24, 32 }
  0x3c   :  { %291 = vperm.xlu0 %373, %v288_v8   ;;  %p463_p6 = scmp.ne.s32.totalorder %s314_s24, %s462_s5  ;;  %p467_p7 = scmp.lt.s32.totalorder %s314_s24, %s314_s24 }
  0x3d   :  { %345 = vmatpush3.bf16.msra.mxu0 %v376_v4  ;;  %353 = vmatpush3.bf16.msra.mxu1 %v377_v5  ;;  %p468_p8 = scmp.lt.s32.totalorder %s466_s25, %s462_s5 }
  0x3e   :  { %358 = vmatprep.subr.mxu0 %v496_v1 }
  0x3f   :  { %p469_p9 = por %p468_p8, %p467_p7 }
  0x40   :  { %347 = vmatmul.mubr.msk.bf16.vlgmr.msra.gmra.mxu0 %vm103_vm1, %v86_v6  ;;  %355 = vmatmul.mubr.msk.bf16.vlgmr.msra.gmra.mxu1 %vm103_vm1, %v81_v7 }
  0x41   :  { %360 = vmatprep.mubr.msk.f32.mxu0 %vm497_vm0, %v496_v1  ;;  %p470_p10 = pnand %p469_p9, %p463_p6 }
  0xb7   :  { %v292_v26 = vpop.permute.xlu0 %291 }
  0xb8   :  { %v297_v27 = vrot.slane %v292_v26, %v296_v25 }
 0x100   :  { %v141_v10 = vpop.f32.mrf.mxu0  ;;  %v196_v11 = vpop.f32.mrf.mxu1 }
 0x101   :  { %v197_v13 = vadd.f32 %v196_v11, %v141_v10 }
 0x102   :  { %v348_v14 = vpop.f32.mrf.mxu0  ;;  %v356_v15 = vpop.f32.mrf.mxu1 }
 0x103   :  { %v209_v16 = vadd.f32 %v330_v12, %v197_v13 }
 0x104   :  { %v144_v17 = vpop.f32.mrf.mxu0  ;;  %v199_v18 = vpop.f32.mrf.mxu1 }
 0x105   :  { %v210_v19 = vmax.f32 %v209_v16, 0.0 }
 0x106   :  { %v349_v20 = vpop.f32.mrf.mxu0  ;;  %v357_v21 = vpop.f32.mrf.mxu1 }
 0x107   :  { %359 = vmatpush3.xpose.msk.msra.mxu0 %vm103_vm1, %v210_v19 }
 0x10a   :  { %361 = vmatmul.mubr.msk.f32.vlgmr.msra.gmra.mxu0 %vm103_vm1, %v211_v22 }
 0x1ca   :  { %v284_v28 = vpop.f32.mrf.mxu0 }
 0x1cb   :  { %v298_v29 = vadd.f32 %v297_v27, %v284_v28 }
 0x1cc   :  { %v362_v30 = vpop.f32.mrf.mxu0 }
 0x1cd   :  { %v333_v31 = vmul.f32 -1.442695, %v298_v29 }
 0x1cf   :  { %378 = vpow2.f32 %v333_v31 }
 0x1dc   :  { %v379_v32 = vpop.eup %378 }
 0x1dd   :  { %v302_v33 = vadd.f32 1.0, %v379_v32 }
 0x1df   :  { %380 = vrcp.f32 %v302_v33 }
 0x1ec   :  { %v381_v34 = vpop.eup %380 }
 0x1ed   :  { %306 = vst.msk [vmem:[#allocation11] sm:$0x1] %vm305_vm2, %v381_v34 }
 0x1ee   :  { %473 = shalt.err (!%p470_p10)
}
 0x1ef   :  { %316 = dma.vmem_to_hbm [thread:$0]  %s314_s24, 16, %s578_s7, [#allocation5]  }
 0x1f0   :  { %488 = dma.done.wait [#allocation5], 16  }
 0x1f1   :  { %489 = vsyncadd [#allocation5], 4294967280 }
 0x1f2   :  { %320 = vsyncpa [#allocation4], 1 }
 0x1f3   :  { %321 = vsyncpa [#allocation7], 1 }
 0x1f4   :  { %322 = vsyncpa [#allocation10], 1 }
 0x1f5   :  { %323 = vsyncpa [#allocation5], 1 }

</bundles_post_ra>
